<compile_context>
chip_gen: v6e
topology: v6e:2x2x1
jax: 0.10.0
libtpu: 0.0.40
codegen_flags: <defaults>
</compile_context>

<pallas_src>
import functools
import math

import jax
import jax.numpy as jnp
from jax.experimental import pallas as pl
from jax.experimental.pallas import tpu as pltpu

BN_EPS = 1e-5


def _round_up(x, m):
    return ((x + m - 1) // m) * m


# ---------------------------------------------------------------------------
# Parameter preparation: fold BN eval scale, zero-pad input/hidden dims to 128,
# cast hidden weights to bf16.  Exact except the bf16 cast.  Returns
#   [w1, b1, ..., wH, bH, w_out, b_out]
# For noutput == 1, w_out is stored transposed as (1, h_last_pad) f32 so the
# kernel can do a VPU multiply + lane reduction.
# ---------------------------------------------------------------------------
def prepare_params(layer_ws, layer_bs, *, use_bn=True, pad_to=128, pad_in_to=128,
                   weight_dtype=jnp.bfloat16):
    num_hidden = len(layer_ws) - 1
    s = 1.0 / math.sqrt(1.0 + BN_EPS) if use_bn else 1.0

    prepared = []
    in_pad = _round_up(layer_ws[0].shape[0], pad_in_to)   # padded ninput
    for i in range(num_hidden):
        w = jnp.asarray(layer_ws[i], jnp.float32) * s      # fold BN scale
        b = jnp.asarray(layer_bs[i], jnp.float32).reshape(1, -1) * s
        in_dim, out_dim = w.shape
        out_pad = _round_up(out_dim, pad_to)
        w_full = jnp.zeros((in_pad, out_pad), jnp.float32).at[:in_dim, :out_dim].set(w)
        b_full = jnp.zeros((1, out_pad), jnp.float32).at[:, :out_dim].set(b)
        prepared.append(w_full.astype(weight_dtype))
        prepared.append(b_full)                             # bias stays f32
        in_pad = out_pad

    w = jnp.asarray(layer_ws[-1], jnp.float32)
    b = jnp.asarray(layer_bs[-1], jnp.float32).reshape(1, -1)
    in_dim, noutput = w.shape
    w_full = jnp.zeros((in_pad, noutput), jnp.float32).at[:in_dim, :].set(w)
    if noutput == 1:
        prepared.append(w_full.T)                           # (1, in_pad) f32
    else:
        prepared.append(w_full.astype(weight_dtype))
    prepared.append(b)                                      # (1, noutput) f32
    return prepared


# ---------------------------------------------------------------------------
# Pallas kernel: per batch tile, [Linear -> (folded BN) -> ReLU]* -> final layer
# ---------------------------------------------------------------------------
def _mlp_kernel(num_hidden, noutput, lane_dense, x_ref, *refs):
    out_ref = refs[-1]
    params = refs[:-1]

    h_b = x_ref[...]                                        # (TB, nin_pad) bf16
    h_f = h_b.astype(jnp.float32) if num_hidden == 0 else None

    for i in range(num_hidden):
        w = params[2 * i][...]                              # (in_pad, out_pad) bf16
        b = params[2 * i + 1][...]                          # (1, out_pad) f32
        z = jnp.dot(h_b, w, preferred_element_type=jnp.float32) + b
        h_f = jnp.maximum(z, 0.0)                           # ReLU (Dropout = id)
        h_b = h_f.astype(jnp.bfloat16)

    w_out = params[2 * num_hidden][...]
    b_out = params[2 * num_hidden + 1][...]
    if noutput == 1:
        # VPU multiply + XLU lane reduction instead of an N=1 MXU matmul.
        y_col = jnp.sum(h_f * w_out, axis=-1, keepdims=True) + b_out   # (TB, 1)
        if lane_dense:
            out_ref[...] = jnp.transpose(y_col).astype(out_ref.dtype)  # (1, TB)
        else:
            out_ref[...] = y_col.astype(out_ref.dtype)
    else:
        y = jnp.dot(h_b, w_out, preferred_element_type=jnp.float32) + b_out
        out_ref[...] = y.astype(out_ref.dtype)


# ---------------------------------------------------------------------------
# VMEM budget / batch-tile selection.
# ---------------------------------------------------------------------------
def _vmem_limit_bytes():
    try:
        cap = int(pltpu.get_tpu_info().vmem_capacity_bytes)
    except Exception:
        cap = 64 * 1024 * 1024          # conservative (v7x-sized) fallback
    # ~75% of physical VMEM: ~96 MiB on v5e/v6e (128 MiB), ~48 MiB on v7x (64 MiB)
    return min(cap * 3 // 4, 100 * 1024 * 1024)


def _choose_tb(B, nin_pad, hidden_pads, weight_bytes, vmem_limit, tb, act_buffers):
    # Bytes of VMEM per batch row (streamed activation buffers + f32/bf16
    # intermediates inside the kernel).
    per_row = act_buffers * 2 * nin_pad            # bf16 activation stream
    per_row += 4 * nin_pad                         # f32 view of the input (worst case)
    per_row += 6 * sum(hidden_pads)                # f32 z + bf16 cast per hidden layer
    per_row += 16                                  # head / lane-dense output
    # Count weights at 2x (safe even if single-buffering is unavailable).
    budget = vmem_limit - 2 * weight_bytes - (4 << 20)
    max_tb = max(8, budget // max(per_row, 1))

    TB = min(tb, max_tb)
    # Keep >= 2 grid steps for large batches so both v7x TensorCores get work.
    TB = min(TB, max(256, _round_up(pl.cdiv(B, 2), 256)))
    TB = min(TB, _round_up(B, 8))                  # never exceed the padded batch
    if TB >= 256:
        TB = (TB // 256) * 256                     # full MXU M on v6e/v7x
    else:
        TB = max(8, (TB // 8) * 8)
    return int(TB)


# ---------------------------------------------------------------------------
# pallas_call builder (with graded fallback knobs).
# ---------------------------------------------------------------------------
def _mlp_pallas(x, prepared, num_hidden, noutput, TB, vmem_limit, *,
                single_buffer_weights, lane_dense, act_buffers=2):
    B_pad, nin_pad = x.shape
    num_tiles = B_pad // TB
    kernel = functools.partial(_mlp_kernel, num_hidden, noutput, lane_dense)

    if act_buffers == 2:
        act_spec = pl.BlockSpec((TB, nin_pad), lambda i: (i, 0))
    else:
        act_spec = pl.BlockSpec((TB, nin_pad), lambda i: (i, 0),
                                pipeline_mode=pl.Buffered(act_buffers))
    if single_buffer_weights:
        # Constant index map -> weights fetched once; single-buffered (1x VMEM).
        w_specs = [pl.BlockSpec(p.shape, lambda i: (0, 0),
                                pipeline_mode=pl.Buffered(1)) for p in prepared]
    else:
        w_specs = [pl.BlockSpec(p.shape, lambda i: (0, 0)) for p in prepared]
    in_specs = [act_spec] + w_specs

    if lane_dense:
        out_shape = jax.ShapeDtypeStruct((num_tiles, 1, TB), jnp.float32)
        out_specs = pl.BlockSpec((None, 1, TB), lambda i: (i, 0, 0))
    else:
        out_shape = jax.ShapeDtypeStruct((B_pad, noutput), jnp.float32)
        out_specs = pl.BlockSpec((TB, noutput), lambda i: (i, 0))

    out = pl.pallas_call(
        kernel,
        out_shape=out_shape,
        grid=(num_tiles,),
        in_specs=in_specs,
        out_specs=out_specs,
        compiler_params=pltpu.CompilerParams(
            dimension_semantics=("parallel",),       # shards across v7x's 2 TCs
            vmem_limit_bytes=int(vmem_limit)),
    )(x, *prepared)

    if lane_dense:
        return out.reshape(B_pad, 1)
    return out


# ---------------------------------------------------------------------------
# Wrapper: gather/scale/flatten glue in JAX, batch-tiled MLP in Pallas.
# ---------------------------------------------------------------------------
def dnn_forward(ids, values, emb_table, layer_ws, layer_bs, *,
                use_bn=True, tb=1024, pad_to=128, act_buffers=2):
    """Equivalent of DNNModel.forward({'id': ids, 'value': values})."""
    B, F = ids.shape
    E = emb_table.shape[1]
    ninput = F * E
    nin_pad = _round_up(ninput, 128)
    noutput = layer_ws[-1].shape[1]
    num_hidden = len(layer_ws) - 1

    prepared = prepare_params(layer_ws, layer_bs, use_bn=use_bn, pad_to=pad_to)
    hidden_pads = [prepared[2 * i].shape[1] for i in range(num_hidden)]
    weight_bytes = sum(int(p.size) * p.dtype.itemsize for p in prepared)

    vmem_limit = _vmem_limit_bytes()
    TB = _choose_tb(B, nin_pad, hidden_pads, weight_bytes, vmem_limit, tb, act_buffers)
    B_pad = pl.cdiv(B, TB) * TB

    # Glue: embedding gather + value scaling + flatten, cast to bf16 (halves the
    # activation DMA), pad batch to TB multiple and lanes to a 128 multiple.
    emb_flat = (jnp.take(emb_table, ids, axis=0) * values[:, :, None]
                ).reshape(B, ninput).astype(jnp.bfloat16)
    if B_pad != B or nin_pad != ninput:
        emb_flat = jnp.pad(emb_flat, ((0, B_pad - B), (0, nin_pad - ninput)))

    # Most-optimized config first; fall back if this Pallas version rejects
    # pipeline_mode=Buffered(1) or the lane-dense output relayout.
    configs = ((True, True), (False, True), (False, False))
    out, last_err = None, None
    for single_buf, lane_dense in configs:
        try:
            out = _mlp_pallas(emb_flat, prepared, num_hidden, noutput, TB,
                              vmem_limit,
                              single_buffer_weights=single_buf,
                              lane_dense=(lane_dense and noutput == 1),
                              act_buffers=act_buffers)
            break
        except Exception as e:          # pragma: no cover - compat fallback
            last_err = e
            out = None
    if out is None:
        raise last_err

    y = out[:B]
    return jnp.squeeze(y, axis=1) if noutput == 1 else y   # y.squeeze(1)


# ---------------------------------------------------------------------------
# Pure-JAX references.
# ---------------------------------------------------------------------------
def _mlp_ref_prepared(x, prepared, num_hidden, noutput,
                      compute_dtype=jnp.bfloat16):
    """Mirrors the kernel math exactly on the prepared (padded) params."""
    h_b = x.astype(compute_dtype)
    h_f = h_b.astype(jnp.float32)
    for i in range(num_hidden):
        w = prepared[2 * i]
        b = prepared[2 * i + 1]
        z = jnp.dot(h_b, w, preferred_element_type=jnp.float32) + b
        h_f = jnp.maximum(z, 0.0)
        h_b = h_f.astype(compute_dtype)
    w_out = prepared[2 * num_hidden]
    b_out = prepared[2 * num_hidden + 1]
    if noutput == 1:
        y = jnp.sum(h_f * w_out, axis=-1, keepdims=True) + b_out
    else:
        y = jnp.dot(h_b, w_out, preferred_element_type=jnp.float32) + b_out
    return y


def dnn_forward_ref(ids, values, emb_table, layer_ws, layer_bs, *, use_bn=True):
    """Full-precision PyTorch-semantics reference (eval-mode BN)."""
    B, F = ids.shape
    E = emb_table.shape[1]
    h = (jnp.take(emb_table, ids, axis=0) * values[:, :, None]).reshape(B, F * E)
    s = 1.0 / math.sqrt(1.0 + BN_EPS)
    for w, b in zip(layer_ws[:-1], layer_bs[:-1]):
        h = h @ w + b.reshape(1, -1)
        if use_bn:
            h = h * s
        h = jnp.maximum(h, 0.0)
    y = h @ layer_ws[-1] + layer_bs[-1].reshape(1, -1)
    return jnp.squeeze(y, axis=1)


# ---------------------------------------------------------------------------
# Deterministic parameter init (matches shapes / init of the PyTorch module).
# ---------------------------------------------------------------------------
def _xavier_uniform(key, fan_in, fan_out, shape):
    bound = math.sqrt(6.0 / (fan_in + fan_out))
    return jax.random.uniform(key, shape, jnp.float32, -bound, bound)


def init_params(key, nfeat, nemb, ninput, hidden_layer_list, noutput):
    keys = jax.random.split(key, 2 * (len(hidden_layer_list) + 1) + 1)
    k_idx = 0
    emb_table = _xavier_uniform(keys[k_idx], nemb, nfeat, (nfeat, nemb))
    k_idx += 1

    layer_ws, layer_bs = [], []
    in_dim = ninput
    for out_dim in list(hidden_layer_list) + [noutput]:
        w = _xavier_uniform(keys[k_idx], in_dim, out_dim, (in_dim, out_dim))
        k_idx += 1
        bb = 1.0 / math.sqrt(in_dim)
        b = jax.random.uniform(keys[k_idx], (1, out_dim), jnp.float32, -bb, bb)
        k_idx += 1
        layer_ws.append(w)
        layer_bs.append(b)
        in_dim = out_dim
    return emb_table, layer_ws, layer_bs


if __name__ == "__main__":
    # Small, module-consistent shapes.
    B, nfield, nfeat, nemb = 8, 4, 32, 8
    hidden_layer_list = [32, 16]
    noutput = 1
    ninput = nfield * nemb
    nin_pad = _round_up(ninput, 128)

    key = jax.random.PRNGKey(0)
    k_param, k_id, k_val = jax.random.split(key, 3)

    emb_table, layer_ws, layer_bs = init_params(
        k_param, nfeat, nemb, ninput, hidden_layer_list, noutput)

    ids = jax.random.randint(k_id, (B, nfield), 0, nfeat, dtype=jnp.int32)
    values = jax.random.uniform(k_val, (B, nfield), jnp.float32)

    y = dnn_forward(ids, values, emb_table, layer_ws, layer_bs, use_bn=True)
    y = jax.block_until_ready(y)
    assert y.shape == (B,)

    # (1) Tight check: kernel vs. pure-JAX path on the exact same prepared
    #     (bf16, BN-folded, padded) params — validates tiling / kernel plumbing.
    prepared_bf16 = prepare_params(layer_ws, layer_bs, use_bn=True)
    emb_flat_bf16 = (jnp.take(emb_table, ids, axis=0) * values[:, :, None]
                     ).reshape(B, ninput).astype(jnp.bfloat16)
    x_pad_bf16 = jnp.pad(emb_flat_bf16, ((0, 0), (0, nin_pad - ninput)))
    y_tight = jnp.squeeze(
        _mlp_ref_prepared(x_pad_bf16, prepared_bf16, len(layer_ws) - 1,
                          noutput, compute_dtype=jnp.bfloat16), axis=1)
    assert jnp.allclose(y, y_tight, atol=2e-3, rtol=2e-3), (y, y_tight)

    # (2) Exact semantic check of the parameter transforms (BN folding, padding,
    #     transposed final layer) in full f32 against the PyTorch-semantics ref.
    prepared_f32 = prepare_params(layer_ws, layer_bs, use_bn=True,
                                  weight_dtype=jnp.float32)
    emb_flat_f32 = (jnp.take(emb_table, ids, axis=0) * values[:, :, None]
                    ).reshape(B, ninput)
    x_pad_f32 = jnp.pad(emb_flat_f32, ((0, 0), (0, nin_pad - ninput)))
    y_f32 = jnp.squeeze(
        _mlp_ref_prepared(x_pad_f32, prepared_f32, len(layer_ws) - 1,
                          noutput, compute_dtype=jnp.float32), axis=1)
    y_ref = dnn_forward_ref(ids, values, emb_table, layer_ws, layer_bs, use_bn=True)
    assert jnp.allclose(y_f32, y_ref, atol=1e-4, rtol=1e-4), (y_f32, y_ref)

    print("KERNEL_OK")
</pallas_src>

<mosaic_0001>
module attributes {stable_mosaic.version = 11 : i64} {
  func.func @_mlp_kernel(%arg0: i32, %arg1: memref<8x128xbf16, #tpu.memory_space<vmem>>, %arg2: memref<128x128xbf16, #tpu.memory_space<vmem>>, %arg3: memref<1x128xf32, #tpu.memory_space<vmem>>, %arg4: memref<128x128xbf16, #tpu.memory_space<vmem>>, %arg5: memref<1x128xf32, #tpu.memory_space<vmem>>, %arg6: memref<1x128xf32, #tpu.memory_space<vmem>>, %arg7: memref<1x1xf32, #tpu.memory_space<vmem>>, %arg8: memref<1x1x8xf32, #tpu.memory_space<vmem>>) attributes {dimension_semantics = [#tpu.dimension_semantics<parallel>], iteration_bounds = array<i64: 1>, scalar_prefetch = 0 : i64, scratch_operands = 0 : i64, tpu.core_type = #tpu.core_type<tc>, window_params = [{transform_indices = @transform_0, window_bounds = array<i64: 8, 128>}, {pipeline_mode = #tpu.pipeline_mode<synchronous>, transform_indices = @transform_1, window_bounds = array<i64: 128, 128>}, {pipeline_mode = #tpu.pipeline_mode<synchronous>, transform_indices = @transform_2, window_bounds = array<i64: 1, 128>}, {pipeline_mode = #tpu.pipeline_mode<synchronous>, transform_indices = @transform_3, window_bounds = array<i64: 128, 128>}, {pipeline_mode = #tpu.pipeline_mode<synchronous>, transform_indices = @transform_4, window_bounds = array<i64: 1, 128>}, {pipeline_mode = #tpu.pipeline_mode<synchronous>, transform_indices = @transform_5, window_bounds = array<i64: 1, 128>}, {pipeline_mode = #tpu.pipeline_mode<synchronous>, transform_indices = @transform_6, window_bounds = array<i64: 1, 1>}, {transform_indices = @transform_7, window_bounds = array<i64: 1, 1, 8>}]} {
    %c0 = arith.constant 0 : index
    %c0_0 = arith.constant 0 : index
    %0 = vector.load %arg1[%c0, %c0_0] : memref<8x128xbf16, #tpu.memory_space<vmem>>, vector<8x128xbf16>
    %c0_1 = arith.constant 0 : index
    %c0_2 = arith.constant 0 : index
    %1 = vector.load %arg2[%c0_1, %c0_2] : memref<128x128xbf16, #tpu.memory_space<vmem>>, vector<128x128xbf16>
    %c0_3 = arith.constant 0 : index
    %c0_4 = arith.constant 0 : index
    %2 = vector.load %arg3[%c0_3, %c0_4] : memref<1x128xf32, #tpu.memory_space<vmem>>, vector<1x128xf32>
    %cst = arith.constant dense<0.000000e+00> : vector<8x128xf32>
    %3 = tpu.matmul %0, %1, %cst {dimension_numbers = #tpu.dot_dimension_numbers<[1], [0], [0], [1], [0, 0, 1, 1], [], []>} : vector<8x128xbf16>, vector<128x128xbf16>, vector<8x128xf32> -> vector<8x128xf32>
    %4 = vector.broadcast %2 : vector<1x128xf32> to vector<8x128xf32>
    %5 = arith.addf %3, %4 : vector<8x128xf32>
    %cst_5 = arith.constant 0.000000e+00 : f32
    %6 = vector.broadcast %cst_5 : f32 to vector<8x128xf32>
    %7 = arith.maximumf %5, %6 : vector<8x128xf32>
    %8 = arith.truncf %7 : vector<8x128xf32> to vector<8x128xbf16>
    %c0_6 = arith.constant 0 : index
    %c0_7 = arith.constant 0 : index
    %9 = vector.load %arg4[%c0_6, %c0_7] : memref<128x128xbf16, #tpu.memory_space<vmem>>, vector<128x128xbf16>
    %c0_8 = arith.constant 0 : index
    %c0_9 = arith.constant 0 : index
    %10 = vector.load %arg5[%c0_8, %c0_9] : memref<1x128xf32, #tpu.memory_space<vmem>>, vector<1x128xf32>
    %cst_10 = arith.constant dense<0.000000e+00> : vector<8x128xf32>
    %11 = tpu.matmul %8, %9, %cst_10 {dimension_numbers = #tpu.dot_dimension_numbers<[1], [0], [0], [1], [0, 0, 1, 1], [], []>} : vector<8x128xbf16>, vector<128x128xbf16>, vector<8x128xf32> -> vector<8x128xf32>
    %12 = vector.broadcast %10 : vector<1x128xf32> to vector<8x128xf32>
    %13 = arith.addf %11, %12 : vector<8x128xf32>
    %cst_11 = arith.constant 0.000000e+00 : f32
    %14 = vector.broadcast %cst_11 : f32 to vector<8x128xf32>
    %15 = arith.maximumf %13, %14 : vector<8x128xf32>
    %c0_12 = arith.constant 0 : index
    %c0_13 = arith.constant 0 : index
    %16 = vector.load %arg6[%c0_12, %c0_13] : memref<1x128xf32, #tpu.memory_space<vmem>>, vector<1x128xf32>
    %c0_14 = arith.constant 0 : index
    %c0_15 = arith.constant 0 : index
    %17 = vector.load %arg7[%c0_14, %c0_15] : memref<1x1xf32, #tpu.memory_space<vmem>>, vector<1x1xf32>
    %18 = vector.broadcast %16 : vector<1x128xf32> to vector<8x128xf32>
    %19 = arith.mulf %15, %18 : vector<8x128xf32>
    %cst_16 = arith.constant dense<0.000000e+00> : vector<8xf32>
    %20 = vector.multi_reduction <add>, %19, %cst_16 [1] : vector<8x128xf32> to vector<8xf32>
    %21 = vector.shape_cast %20 : vector<8xf32> to vector<8x1xf32>
    %22 = vector.broadcast %17 : vector<1x1xf32> to vector<8x1xf32>
    %23 = arith.addf %21, %22 : vector<8x1xf32>
    %24 = tpu.transpose %23, [1, 0] : vector<8x1xf32> -> vector<1x8xf32>
    %c0_17 = arith.constant 0 : index
    %c0_18 = arith.constant 0 : index
    %c0_19 = arith.constant 0 : index
    %25 = vector.load %arg8[%c0_17, %c0_18, %c0_19] : memref<1x1x8xf32, #tpu.memory_space<vmem>>, vector<1x1x8xf32>
    %26 = vector.shape_cast %25 : vector<1x1x8xf32> to vector<1x8xf32>
    %27 = vector.shape_cast %24 : vector<1x8xf32> to vector<1x1x8xf32>
    tpu.vector_store %arg8[%c0_17, %c0_18, %c0_19], %27 {strides = array<i32>} : memref<1x1x8xf32, #tpu.memory_space<vmem>>, vector<1x1x8xf32>,
    return
  }
  func.func @transform_0(%arg0: i32) -> (i32, i32) {
    %c0_i32 = arith.constant 0 : i32
    %c0_i32_0 = arith.constant 0 : i32
    return %arg0, %c0_i32 : i32, i32
  }
  func.func @transform_1(%arg0: i32) -> (i32, i32) {
    %c0_i32 = arith.constant 0 : i32
    %c0_i32_0 = arith.constant 0 : i32
    %c0_i32_1 = arith.constant 0 : i32
    return %c0_i32, %c0_i32_0 : i32, i32
  }
  func.func @transform_2(%arg0: i32) -> (i32, i32) {
    %c0_i32 = arith.constant 0 : i32
    %c0_i32_0 = arith.constant 0 : i32
    %c0_i32_1 = arith.constant 0 : i32
    return %c0_i32, %c0_i32_0 : i32, i32
  }
  func.func @transform_3(%arg0: i32) -> (i32, i32) {
    %c0_i32 = arith.constant 0 : i32
    %c0_i32_0 = arith.constant 0 : i32
    %c0_i32_1 = arith.constant 0 : i32
    return %c0_i32, %c0_i32_0 : i32, i32
  }
  func.func @transform_4(%arg0: i32) -> (i32, i32) {
    %c0_i32 = arith.constant 0 : i32
    %c0_i32_0 = arith.constant 0 : i32
    %c0_i32_1 = arith.constant 0 : i32
    return %c0_i32, %c0_i32_0 : i32, i32
  }
  func.func @transform_5(%arg0: i32) -> (i32, i32) {
    %c0_i32 = arith.constant 0 : i32
    %c0_i32_0 = arith.constant 0 : i32
    %c0_i32_1 = arith.constant 0 : i32
    return %c0_i32, %c0_i32_0 : i32, i32
  }
  func.func @transform_6(%arg0: i32) -> (i32, i32) {
    %c0_i32 = arith.constant 0 : i32
    %c0_i32_0 = arith.constant 0 : i32
    %c0_i32_1 = arith.constant 0 : i32
    return %c0_i32, %c0_i32_0 : i32, i32
  }
  func.func @transform_7(%arg0: i32) -> (i32, i32, i32) {
    %c0_i32 = arith.constant 0 : i32
    %c0_i32_0 = arith.constant 0 : i32
    %c0_i32_1 = arith.constant 0 : i32
    return %arg0, %c0_i32, %c0_i32_0 : i32, i32, i32
  }
}

module attributes {stable_mosaic.version = 11 : i64} {
  func.func @_mlp_kernel(%arg0: i32, %arg1: memref<8x128xbf16, #tpu.memory_space<vmem>>, %arg2: memref<128x128xbf16, #tpu.memory_space<vmem>>, %arg3: memref<1x128xf32, #tpu.memory_space<vmem>>, %arg4: memref<128x128xbf16, #tpu.memory_space<vmem>>, %arg5: memref<1x128xf32, #tpu.memory_space<vmem>>, %arg6: memref<1x128xf32, #tpu.memory_space<vmem>>, %arg7: memref<1x1xf32, #tpu.memory_space<vmem>>, %arg8: memref<1x1x8xf32, #tpu.memory_space<vmem>>) attributes {dimension_semantics = [#tpu.dimension_semantics<parallel>], iteration_bounds = array<i64: 1>, scalar_prefetch = 0 : i64, scratch_operands = 0 : i64, tpu.core_type = #tpu.core_type<tc>, window_params = [{transform_indices = @transform_0, window_bounds = array<i64: 8, 128>}, {pipeline_mode = #tpu.pipeline_mode<synchronous>, transform_indices = @transform_1, window_bounds = array<i64: 128, 128>}, {pipeline_mode = #tpu.pipeline_mode<synchronous>, transform_indices = @transform_2, window_bounds = array<i64: 1, 128>}, {pipeline_mode = #tpu.pipeline_mode<synchronous>, transform_indices = @transform_3, window_bounds = array<i64: 128, 128>}, {pipeline_mode = #tpu.pipeline_mode<synchronous>, transform_indices = @transform_4, window_bounds = array<i64: 1, 128>}, {pipeline_mode = #tpu.pipeline_mode<synchronous>, transform_indices = @transform_5, window_bounds = array<i64: 1, 128>}, {pipeline_mode = #tpu.pipeline_mode<synchronous>, transform_indices = @transform_6, window_bounds = array<i64: 1, 1>}, {transform_indices = @transform_7, window_bounds = array<i64: 1, 1, 8>}]} {
    %c0 = arith.constant 0 : index
    %c0_0 = arith.constant 0 : index
    %0 = vector.load %arg1[%c0, %c0_0] : memref<8x128xbf16, #tpu.memory_space<vmem>>, vector<8x128xbf16>
    %c0_1 = arith.constant 0 : index
    %c0_2 = arith.constant 0 : index
    %1 = vector.load %arg2[%c0_1, %c0_2] : memref<128x128xbf16, #tpu.memory_space<vmem>>, vector<128x128xbf16>
    %c0_3 = arith.constant 0 : index
    %c0_4 = arith.constant 0 : index
    %2 = vector.load %arg3[%c0_3, %c0_4] : memref<1x128xf32, #tpu.memory_space<vmem>>, vector<1x128xf32>
    %cst = arith.constant dense<0.000000e+00> : vector<8x128xf32>
    %3 = tpu.matmul %0, %1, %cst {dimension_numbers = #tpu.dot_dimension_numbers<[1], [0], [0], [1], [0, 0, 1, 1], [], []>} : vector<8x128xbf16>, vector<128x128xbf16>, vector<8x128xf32> -> vector<8x128xf32>
    %4 = vector.broadcast %2 : vector<1x128xf32> to vector<8x128xf32>
    %5 = arith.addf %3, %4 : vector<8x128xf32>
    %cst_5 = arith.constant 0.000000e+00 : f32
    %6 = vector.broadcast %cst_5 : f32 to vector<8x128xf32>
    %7 = arith.maximumf %5, %6 : vector<8x128xf32>
    %8 = arith.truncf %7 : vector<8x128xf32> to vector<8x128xbf16>
    %c0_6 = arith.constant 0 : index
    %c0_7 = arith.constant 0 : index
    %9 = vector.load %arg4[%c0_6, %c0_7] : memref<128x128xbf16, #tpu.memory_space<vmem>>, vector<128x128xbf16>
    %c0_8 = arith.constant 0 : index
    %c0_9 = arith.constant 0 : index
    %10 = vector.load %arg5[%c0_8, %c0_9] : memref<1x128xf32, #tpu.memory_space<vmem>>, vector<1x128xf32>
    %cst_10 = arith.constant dense<0.000000e+00> : vector<8x128xf32>
    %11 = tpu.matmul %8, %9, %cst_10 {dimension_numbers = #tpu.dot_dimension_numbers<[1], [0], [0], [1], [0, 0, 1, 1], [], []>} : vector<8x128xbf16>, vector<128x128xbf16>, vector<8x128xf32> -> vector<8x128xf32>
    %12 = vector.broadcast %10 : vector<1x128xf32> to vector<8x128xf32>
    %13 = arith.addf %11, %12 : vector<8x128xf32>
    %cst_11 = arith.constant 0.000000e+00 : f32
    %14 = vector.broadcast %cst_11 : f32 to vector<8x128xf32>
    %15 = arith.maximumf %13, %14 : vector<8x128xf32>
    %c0_12 = arith.constant 0 : index
    %c0_13 = arith.constant 0 : index
    %16 = vector.load %arg6[%c0_12, %c0_13] : memref<1x128xf32, #tpu.memory_space<vmem>>, vector<1x128xf32>
    %c0_14 = arith.constant 0 : index
    %c0_15 = arith.constant 0 : index
    %17 = vector.load %arg7[%c0_14, %c0_15] : memref<1x1xf32, #tpu.memory_space<vmem>>, vector<1x1xf32>
    %18 = vector.broadcast %16 : vector<1x128xf32> to vector<8x128xf32>
    %19 = arith.mulf %15, %18 : vector<8x128xf32>
    %cst_16 = arith.constant dense<0.000000e+00> : vector<8xf32>
    %20 = vector.multi_reduction <add>, %19, %cst_16 [1] : vector<8x128xf32> to vector<8xf32>
    %21 = vector.shape_cast %20 : vector<8xf32> to vector<8x1xf32>
    %22 = vector.broadcast %17 : vector<1x1xf32> to vector<8x1xf32>
    %23 = arith.addf %21, %22 : vector<8x1xf32>
    %24 = tpu.transpose %23, [1, 0] : vector<8x1xf32> -> vector<1x8xf32>
    %c0_17 = arith.constant 0 : index
    %c0_18 = arith.constant 0 : index
    %c0_19 = arith.constant 0 : index
    %25 = vector.load %arg8[%c0_17, %c0_18, %c0_19] : memref<1x1x8xf32, #tpu.memory_space<vmem>>, vector<1x1x8xf32>
    %26 = vector.shape_cast %25 : vector<1x1x8xf32> to vector<1x8xf32>
    %27 = vector.shape_cast %24 : vector<1x8xf32> to vector<1x1x8xf32>
    tpu.vector_store %arg8[%c0_17, %c0_18, %c0_19], %27 {strides = array<i32>} : memref<1x1x8xf32, #tpu.memory_space<vmem>>, vector<1x1x8xf32>,
    return
  }
  func.func @transform_0(%arg0: i32) -> (i32, i32) {
    %c0_i32 = arith.constant 0 : i32
    %c0_i32_0 = arith.constant 0 : i32
    return %arg0, %c0_i32 : i32, i32
  }
  func.func @transform_1(%arg0: i32) -> (i32, i32) {
    %c0_i32 = arith.constant 0 : i32
    %c0_i32_0 = arith.constant 0 : i32
    %c0_i32_1 = arith.constant 0 : i32
    return %c0_i32, %c0_i32_0 : i32, i32
  }
  func.func @transform_2(%arg0: i32) -> (i32, i32) {
    %c0_i32 = arith.constant 0 : i32
    %c0_i32_0 = arith.constant 0 : i32
    %c0_i32_1 = arith.constant 0 : i32
    return %c0_i32, %c0_i32_0 : i32, i32
  }
  func.func @transform_3(%arg0: i32) -> (i32, i32) {
    %c0_i32 = arith.constant 0 : i32
    %c0_i32_0 = arith.constant 0 : i32
    %c0_i32_1 = arith.constant 0 : i32
    return %c0_i32, %c0_i32_0 : i32, i32
  }
  func.func @transform_4(%arg0: i32) -> (i32, i32) {
    %c0_i32 = arith.constant 0 : i32
    %c0_i32_0 = arith.constant 0 : i32
    %c0_i32_1 = arith.constant 0 : i32
    return %c0_i32, %c0_i32_0 : i32, i32
  }
  func.func @transform_5(%arg0: i32) -> (i32, i32) {
    %c0_i32 = arith.constant 0 : i32
    %c0_i32_0 = arith.constant 0 : i32
    %c0_i32_1 = arith.constant 0 : i32
    return %c0_i32, %c0_i32_0 : i32, i32
  }
  func.func @transform_6(%arg0: i32) -> (i32, i32) {
    %c0_i32 = arith.constant 0 : i32
    %c0_i32_0 = arith.constant 0 : i32
    %c0_i32_1 = arith.constant 0 : i32
    return %c0_i32, %c0_i32_0 : i32, i32
  }
  func.func @transform_7(%arg0: i32) -> (i32, i32, i32) {
    %c0_i32 = arith.constant 0 : i32
    %c0_i32_0 = arith.constant 0 : i32
    %c0_i32_1 = arith.constant 0 : i32
    return %arg0, %c0_i32, %c0_i32_0 : i32, i32, i32
  }
}

module attributes {stable_mosaic.version = 11 : i64} {
  func.func @_mlp_kernel(%arg0: i32, %arg1: memref<8x128xbf16, #tpu.memory_space<vmem>>, %arg2: memref<128x128xbf16, #tpu.memory_space<vmem>>, %arg3: memref<1x128xf32, #tpu.memory_space<vmem>>, %arg4: memref<128x128xbf16, #tpu.memory_space<vmem>>, %arg5: memref<1x128xf32, #tpu.memory_space<vmem>>, %arg6: memref<1x128xf32, #tpu.memory_space<vmem>>, %arg7: memref<1x1xf32, #tpu.memory_space<vmem>>, %arg8: memref<8x1xf32, #tpu.memory_space<vmem>>) attributes {dimension_semantics = [#tpu.dimension_semantics<parallel>], iteration_bounds = array<i64: 1>, scalar_prefetch = 0 : i64, scratch_operands = 0 : i64, tpu.core_type = #tpu.core_type<tc>, window_params = [{transform_indices = @transform_0, window_bounds = array<i64: 8, 128>}, {pipeline_mode = #tpu.pipeline_mode<synchronous>, transform_indices = @transform_1, window_bounds = array<i64: 128, 128>}, {pipeline_mode = #tpu.pipeline_mode<synchronous>, transform_indices = @transform_2, window_bounds = array<i64: 1, 128>}, {pipeline_mode = #tpu.pipeline_mode<synchronous>, transform_indices = @transform_3, window_bounds = array<i64: 128, 128>}, {pipeline_mode = #tpu.pipeline_mode<synchronous>, transform_indices = @transform_4, window_bounds = array<i64: 1, 128>}, {pipeline_mode = #tpu.pipeline_mode<synchronous>, transform_indices = @transform_5, window_bounds = array<i64: 1, 128>}, {pipeline_mode = #tpu.pipeline_mode<synchronous>, transform_indices = @transform_6, window_bounds = array<i64: 1, 1>}, {transform_indices = @transform_7, window_bounds = array<i64: 8, 1>}]} {
    %c0 = arith.constant 0 : index
    %c0_0 = arith.constant 0 : index
    %0 = vector.load %arg1[%c0, %c0_0] : memref<8x128xbf16, #tpu.memory_space<vmem>>, vector<8x128xbf16>
    %c0_1 = arith.constant 0 : index
    %c0_2 = arith.constant 0 : index
    %1 = vector.load %arg2[%c0_1, %c0_2] : memref<128x128xbf16, #tpu.memory_space<vmem>>, vector<128x128xbf16>
    %c0_3 = arith.constant 0 : index
    %c0_4 = arith.constant 0 : index
    %2 = vector.load %arg3[%c0_3, %c0_4] : memref<1x128xf32, #tpu.memory_space<vmem>>, vector<1x128xf32>
    %cst = arith.constant dense<0.000000e+00> : vector<8x128xf32>
    %3 = tpu.matmul %0, %1, %cst {dimension_numbers = #tpu.dot_dimension_numbers<[1], [0], [0], [1], [0, 0, 1, 1], [], []>} : vector<8x128xbf16>, vector<128x128xbf16>, vector<8x128xf32> -> vector<8x128xf32>
    %4 = vector.broadcast %2 : vector<1x128xf32> to vector<8x128xf32>
    %5 = arith.addf %3, %4 : vector<8x128xf32>
    %cst_5 = arith.constant 0.000000e+00 : f32
    %6 = vector.broadcast %cst_5 : f32 to vector<8x128xf32>
    %7 = arith.maximumf %5, %6 : vector<8x128xf32>
    %8 = arith.truncf %7 : vector<8x128xf32> to vector<8x128xbf16>
    %c0_6 = arith.constant 0 : index
    %c0_7 = arith.constant 0 : index
    %9 = vector.load %arg4[%c0_6, %c0_7] : memref<128x128xbf16, #tpu.memory_space<vmem>>, vector<128x128xbf16>
    %c0_8 = arith.constant 0 : index
    %c0_9 = arith.constant 0 : index
    %10 = vector.load %arg5[%c0_8, %c0_9] : memref<1x128xf32, #tpu.memory_space<vmem>>, vector<1x128xf32>
    %cst_10 = arith.constant dense<0.000000e+00> : vector<8x128xf32>
    %11 = tpu.matmul %8, %9, %cst_10 {dimension_numbers = #tpu.dot_dimension_numbers<[1], [0], [0], [1], [0, 0, 1, 1], [], []>} : vector<8x128xbf16>, vector<128x128xbf16>, vector<8x128xf32> -> vector<8x128xf32>
    %12 = vector.broadcast %10 : vector<1x128xf32> to vector<8x128xf32>
    %13 = arith.addf %11, %12 : vector<8x128xf32>
    %cst_11 = arith.constant 0.000000e+00 : f32
    %14 = vector.broadcast %cst_11 : f32 to vector<8x128xf32>
    %15 = arith.maximumf %13, %14 : vector<8x128xf32>
    %c0_12 = arith.constant 0 : index
    %c0_13 = arith.constant 0 : index
    %16 = vector.load %arg6[%c0_12, %c0_13] : memref<1x128xf32, #tpu.memory_space<vmem>>, vector<1x128xf32>
    %c0_14 = arith.constant 0 : index
    %c0_15 = arith.constant 0 : index
    %17 = vector.load %arg7[%c0_14, %c0_15] : memref<1x1xf32, #tpu.memory_space<vmem>>, vector<1x1xf32>
    %18 = vector.broadcast %16 : vector<1x128xf32> to vector<8x128xf32>
    %19 = arith.mulf %15, %18 : vector<8x128xf32>
    %cst_16 = arith.constant dense<0.000000e+00> : vector<8xf32>
    %20 = vector.multi_reduction <add>, %19, %cst_16 [1] : vector<8x128xf32> to vector<8xf32>
    %21 = vector.shape_cast %20 : vector<8xf32> to vector<8x1xf32>
    %22 = vector.broadcast %17 : vector<1x1xf32> to vector<8x1xf32>
    %23 = arith.addf %21, %22 : vector<8x1xf32>
    %c0_17 = arith.constant 0 : index
    %c0_18 = arith.constant 0 : index
    %24 = vector.load %arg8[%c0_17, %c0_18] : memref<8x1xf32, #tpu.memory_space<vmem>>, vector<8x1xf32>
    tpu.vector_store %arg8[%c0_17, %c0_18], %23 {strides = array<i32>} : memref<8x1xf32, #tpu.memory_space<vmem>>, vector<8x1xf32>,
    return
  }
  func.func @transform_0(%arg0: i32) -> (i32, i32) {
    %c0_i32 = arith.constant 0 : i32
    %c0_i32_0 = arith.constant 0 : i32
    return %arg0, %c0_i32 : i32, i32
  }
  func.func @transform_1(%arg0: i32) -> (i32, i32) {
    %c0_i32 = arith.constant 0 : i32
    %c0_i32_0 = arith.constant 0 : i32
    %c0_i32_1 = arith.constant 0 : i32
    return %c0_i32, %c0_i32_0 : i32, i32
  }
  func.func @transform_2(%arg0: i32) -> (i32, i32) {
    %c0_i32 = arith.constant 0 : i32
    %c0_i32_0 = arith.constant 0 : i32
    %c0_i32_1 = arith.constant 0 : i32
    return %c0_i32, %c0_i32_0 : i32, i32
  }
  func.func @transform_3(%arg0: i32) -> (i32, i32) {
    %c0_i32 = arith.constant 0 : i32
    %c0_i32_0 = arith.constant 0 : i32
    %c0_i32_1 = arith.constant 0 : i32
    return %c0_i32, %c0_i32_0 : i32, i32
  }
  func.func @transform_4(%arg0: i32) -> (i32, i32) {
    %c0_i32 = arith.constant 0 : i32
    %c0_i32_0 = arith.constant 0 : i32
    %c0_i32_1 = arith.constant 0 : i32
    return %c0_i32, %c0_i32_0 : i32, i32
  }
  func.func @transform_5(%arg0: i32) -> (i32, i32) {
    %c0_i32 = arith.constant 0 : i32
    %c0_i32_0 = arith.constant 0 : i32
    %c0_i32_1 = arith.constant 0 : i32
    return %c0_i32, %c0_i32_0 : i32, i32
  }
  func.func @transform_6(%arg0: i32) -> (i32, i32) {
    %c0_i32 = arith.constant 0 : i32
    %c0_i32_0 = arith.constant 0 : i32
    %c0_i32_1 = arith.constant 0 : i32
    return %c0_i32, %c0_i32_0 : i32, i32
  }
  func.func @transform_7(%arg0: i32) -> (i32, i32) {
    %c0_i32 = arith.constant 0 : i32
    %c0_i32_0 = arith.constant 0 : i32
    return %arg0, %c0_i32 : i32, i32
  }
}

</mosaic_0001>

<bundles_post_ra>
// kernel: tpu_custom_call.1
= control target key start
LH: loop header
LB: loop body
LE: loop exit
PB: predicated region body
PF: predicated region fallthrough
CT: control target
= control target key end

     0   :  { %s623_s0 = inlined_call_operand.hbm [shape: bf16[8,128], index: 0, kind: input, shape index: {}]   ;;  %s624_s1 = inlined_call_operand.hbm [shape: bf16[128,128], index: 1, kind: input, shape index: {}]   ;;  %s625_s2 = inlined_call_operand.vmem [shape: f32[1,128], index: 2, kind: input, shape index: {}]   ;;  %s626_s3 = inlined_call_operand.hbm [shape: bf16[128,128], index: 3, kind: input, shape index: {}]   ;;  %s627_s4 = inlined_call_operand.vmem [shape: f32[1,128], index: 4, kind: input, shape index: {}]   ;;  %s628_s5 = inlined_call_operand.vmem [shape: f32[1,128], index: 5, kind: input, shape index: {}]   ;;  %s629_s6 = inlined_call_operand.<no memory space> [shape: f32[1,1], index: 6, kind: input, shape index: {}]   ;;  %s630_s7 = inlined_call_operand.hbm [shape: f32[1,1,8], index: 7, kind: output, shape index: {}]  }
   0x1   :  { %v12_v0 = vstv %s629_s6 }
   0x2   :  { %13 = vst [vmem:[#allocation2] sm:$0x1] %v12_v0 }
   0x3   :  { %14 = vsyncpa [#allocation4], 0 }
   0x4   :  { %15 = vsyncpa [#allocation7], 0 }
   0x5   :  { %16 = vsyncpa [#allocation5], 0  ;;  %s551_s26 = smov [#allocation6]  }
   0x6   :  { %s32_s27 = sshll.u32 %s551_s26, 4  ;;  %s33_s27 = int_to_ptr.vmem [resolvable:$true] %s32_s27 }
   0x7   :  { %s473_s28 = scalar_lea.vmem %s33_s27, 1024  ;;  %p478_p1 = scmp.lt.s32.totalorder %s33_s27, %s33_s27 }
   0x8   :  { %p474_p0 = scmp.ne.s32.totalorder %s33_s27, %s473_s28  ;;  %p479_p2 = scmp.lt.s32.totalorder %s473_s28, %s473_s28 }
   0xa   :  { %p480_p3 = por %p479_p2, %p478_p1 }
   0xc   :  { %p481_p4 = pnand %p480_p3, %p474_p0 }
   0xe   :  { %484 = shalt.err (!%p481_p4)
}
   0xf   :  { %s552_s29 = smov 64   ;;  %s553_s30 = smov 4  }
  0x10   :  { %38 = dma.hbm_to_vmem [thread:$0]  %s624_s1, 1024, %s33_s27, [#allocation7], %s552_s29, %s552_s29, %s553_s30  }
  0x11   :  { %s554_s6 = smov [#allocation3]   ;;  %s555_s11 = smov [#allocation8]  }
  0x12   :  { %s23_s10 = sshll.u32 %s554_s6, 4  ;;  %s46_s12 = sshll.u32 %s555_s11, 4  ;;  %s24_s10 = int_to_ptr.vmem [resolvable:$true] %s23_s10  ;;  %s47_s12 = int_to_ptr.vmem [resolvable:$true] %s46_s12 }
  0x13   :  { %s493_s13 = scalar_lea.vmem %s24_s10, 64  ;;  %p498_p6 = scmp.lt.s32.totalorder %s24_s10, %s24_s10 }
  0x14   :  { %p494_p5 = scmp.ne.s32.totalorder %s24_s10, %s493_s13  ;;  %p499_p7 = scmp.lt.s32.totalorder %s493_s13, %s493_s13 }
  0x16   :  { %p500_p8 = por %p499_p7, %p498_p6 }
  0x18   :  { %p501_p9 = pnand %p500_p8, %p494_p5 }
  0x1a   :  { %504 = shalt.err (!%p501_p9)
}
  0x1b   :  { %26 = dma.hbm_to_vmem [thread:$0]  %s623_s0, 64, %s24_s10, [#allocation4]  }
  0x1c   :  { %s513_s16 = scalar_lea.vmem %s47_s12, 1024  ;;  %p518_p11 = scmp.lt.s32.totalorder %s47_s12, %s47_s12 }
  0x1d   :  { %p514_p10 = scmp.ne.s32.totalorder %s47_s12, %s513_s16  ;;  %p519_p12 = scmp.lt.s32.totalorder %s513_s16, %s513_s16 }
  0x1f   :  { %p520_p13 = por %p519_p12, %p518_p11 }
  0x21   :  { %p521_p0 = pnand %p520_p13, %p514_p10 }
  0x23   :  { %524 = shalt.err (!%p521_p0)
}
  0x24   :  { %52 = dma.hbm_to_vmem [thread:$0]  %s626_s3, 1024, %s47_s12, [#allocation7], %s552_s29, %s552_s29, %s553_s30  }
  0x25   :  { %545 = dma.done.wait [#allocation4], 64  }
  0x26   :  { %546 = vsyncadd [#allocation4], 4294967232 }
  0x27   :  { %547 = dma.done.wait [#allocation7], 2048  }
  0x28   :  { %548 = vsyncadd [#allocation7], 4294965248  ;;  %v556_v1 = vmov 0.0   ;;  %vm557_vm0 = vmmov 0   ;;  %v449_v2 = vld [vmem:[#allocation6 + $0x38] sm:$0xff]   ;;  %v450_v3 = vld [vmem:[#allocation6 + $0x30] sm:$0xff]  }
  0x29   :  { %401 = vmatprep.subr.bf16.mxu0 %v556_v1  ;;  %417 = vmatprep.mubr.msk.bf16.mxu0 %vm557_vm0, %v556_v1  ;;  %v451_v4 = vld [vmem:[#allocation6 + $0x28] sm:$0xff]   ;;  %v457_v5 = vld [vmem:[#allocation8 + $0x38] sm:$0xff]   ;;  %v452_v6 = vld [vmem:[#allocation6 + $0x20] sm:$0xff]   ;;  %vm345_vm1 = vcmask 57344  }
  0x2a   :  { %421 = vmatprep.subr.bf16.mxu1 %v556_v1  ;;  %437 = vmatprep.mubr.msk.bf16.mxu1 %vm557_vm0, %v556_v1  ;;  %v458_v7 = vld [vmem:[#allocation8 + $0x30] sm:$0xff]   ;;  %v453_v8 = vld [vmem:[#allocation6 + $0x18] sm:$0xff]   ;;  %v459_v9 = vld [vmem:[#allocation8 + $0x28] sm:$0xff]  }
  0x2b   :  { %402 = vmatpush3.bf16.msra.mxu0 %v449_v2  ;;  %422 = vmatpush3.bf16.msra.mxu1 %v457_v5  ;;  %v454_v10 = vld [vmem:[#allocation6 + $0x10] sm:$0xff]   ;;  %v460_v11 = vld [vmem:[#allocation8 + $0x20] sm:$0xff]   ;;  %v455_v12 = vld [vmem:[#allocation6 + $0x8] sm:$0xff]  }
  0x2c   :  { %403 = vmatprep.subr.bf16.mxu0 %v556_v1  ;;  %423 = vmatprep.subr.bf16.mxu1 %v556_v1  ;;  %v461_v13 = vld [vmem:[#allocation8 + $0x18] sm:$0xff]   ;;  %v456_v14 = vld [vmem:[#allocation6] sm:$0xff]   ;;  %v462_v15 = vld [vmem:[#allocation8 + $0x10] sm:$0xff]  }
  0x2d   :  { %v69_v16 = vld [vmem:[#allocation3] sm:$0xf]  ;;  %v463_v17 = vld [vmem:[#allocation8 + $0x8] sm:$0xff]   ;;  %v464_v18 = vld [vmem:[#allocation8] sm:$0xff]  }
  0x2e   :  { %v363_v19 = vld [vmem:[%s625_s2] ss:$0 sm:$0xff]  ;;  %s558_s2 = smov [#allocation9]  }
  0x2f   :  { %404 = vmatpush3.bf16.msra.mxu0 %v450_v3  ;;  %424 = vmatpush3.bf16.msra.mxu1 %v458_v7  ;;  %v372_v27 = vld [vmem:[%s627_s4] ss:$0 sm:$0xff]  ;;  %s353_s22 = sshll.u32 %s558_s2, 4  ;;  %s354_s22 = int_to_ptr.vmem [resolvable:$true] %s353_s22 }
  0x30   :  { %405 = vmatprep.subr.bf16.mxu0 %v556_v1  ;;  %425 = vmatprep.subr.bf16.mxu1 %v556_v1  ;;  %v381_v31 = vld [vmem:[%s628_s5] ss:$0 sm:$0xff]  ;;  %s525_s4 = scalar_lea.vmem %s354_s22, 16  ;;  %s529_s23 = scalar_lea.vmem %s354_s22, 32 }
  0x31   :  { %v382_v36 = vld [vmem:[#allocation2] ss:$0 sm:$0xff]  ;;  %p526_p1 = scmp.ne.s32.totalorder %s354_s22, %s525_s4  ;;  %p530_p2 = scmp.lt.s32.totalorder %s354_s22, %s354_s22 }
  0x32   :  { %p531_p3 = scmp.lt.s32.totalorder %s529_s23, %s525_s4 }
  0x33   :  { %406 = vmatpush3.bf16.msra.mxu0 %v451_v4  ;;  %426 = vmatpush3.bf16.msra.mxu1 %v459_v9 }
  0x34   :  { %407 = vmatprep.subr.bf16.mxu0 %v556_v1  ;;  %427 = vmatprep.subr.bf16.mxu1 %v556_v1  ;;  %p532_p4 = por %p531_p3, %p530_p2 }
  0x36   :  { %p533_p5 = pnand %p532_p4, %p526_p1 }
  0x37   :  { %408 = vmatpush3.bf16.msra.mxu0 %v452_v6  ;;  %428 = vmatpush3.bf16.msra.mxu1 %v460_v11 }
  0x38   :  { %409 = vmatprep.subr.bf16.mxu0 %v556_v1  ;;  %429 = vmatprep.subr.bf16.mxu1 %v556_v1 }
  0x3b   :  { %410 = vmatpush3.bf16.msra.mxu0 %v453_v8  ;;  %430 = vmatpush3.bf16.msra.mxu1 %v461_v13 }
  0x3c   :  { %411 = vmatprep.subr.bf16.mxu0 %v556_v1  ;;  %431 = vmatprep.subr.bf16.mxu1 %v556_v1 }
  0x3f   :  { %412 = vmatpush3.bf16.msra.mxu0 %v454_v10  ;;  %432 = vmatpush3.bf16.msra.mxu1 %v462_v15 }
  0x40   :  { %413 = vmatprep.subr.bf16.mxu0 %v556_v1  ;;  %433 = vmatprep.subr.bf16.mxu1 %v556_v1 }
  0x43   :  { %414 = vmatpush3.bf16.msra.mxu0 %v455_v12  ;;  %434 = vmatpush3.bf16.msra.mxu1 %v463_v17 }
  0x44   :  { %415 = vmatprep.subr.bf16.mxu0 %v556_v1  ;;  %435 = vmatprep.subr.bf16.mxu1 %v556_v1 }
  0x47   :  { %416 = vmatpush3.bf16.msra.mxu0 %v456_v14  ;;  %436 = vmatpush3.bf16.msra.mxu1 %v464_v18 }
  0x4a   :  { %418 = vmatmul.mubr.bf16.vlgmr.msra.gmra.mxu0 %v69_v16 }
 0x10a   :  { %v175_v20 = vpop.f32.mrf.mxu0 }
 0x10b   :  { %v176_v21 = vadd.f32 %v363_v19, %v175_v20 }
 0x10c   :  { %v419_v22 = vpop.f32.mrf.mxu0 }
 0x10d   :  { %v181_v23 = vmax.f32 %v176_v21, 0.0 }
 0x10e   :  { %v178_v24 = vpop.f32.mrf.mxu0 }
 0x10f   :  { %v182_v25 = vpack.c.bf16 %v181_v23, %v181_v23 }
 0x110   :  { %v420_v26 = vpop.f32.mrf.mxu0 }
 0x111   :  { %438 = vmatmul.mubr.bf16.vlgmr.msra.gmra.mxu1 %v182_v25 }
 0x1d1   :  { %v288_v28 = vpop.f32.mrf.mxu1 }
 0x1d2   :  { %v289_v29 = vadd.f32 %v372_v27, %v288_v28 }
 0x1d3   :  { %v439_v30 = vpop.f32.mrf.mxu1 }
 0x1d4   :  { %v294_v32 = vmax.f32 %v289_v29, 0.0 }
 0x1d5   :  { %v291_v33 = vpop.f32.mrf.mxu1 }
 0x1d6   :  { %v303_v34 = vmul.f32 %v381_v31, %v294_v32 }
 0x1d7   :  { %v440_v35 = vpop.f32.mrf.mxu1 }
 0x1d8   :  { %304 = vadd.xlane.f32.xlu0 %v303_v34 }
 0x261   :  { %v305_v37 = vpop.xlane.xlu0 %304 }
 0x262   :  { %v312_v38 = vadd.f32 %v382_v36, %v305_v37 }
 0x264   :  { %313 = vxpose.xlu0.b32.start.end [1/1] (short) (narrow) %v312_v38, 8 }
 0x2e0   :  { %v329_v39 = vpop.trf.xlu0 }
 0x2e1   :  { %346 = vst.msk [vmem:[#allocation9] sm:$0x1] %vm345_vm1, %v329_v39 }
 0x2e2   :  { %536 = shalt.err (!%p533_p5)
}
 0x2e3   :  { %356 = dma.vmem_to_hbm [thread:$0]  %s354_s22, 16, %s630_s7, [#allocation5]  }
 0x2e4   :  { %549 = dma.done.wait [#allocation5], 16  }
 0x2e5   :  { %550 = vsyncadd [#allocation5], 4294967280 }
 0x2e6   :  { %360 = vsyncpa [#allocation4], 1 }
 0x2e7   :  { %361 = vsyncpa [#allocation7], 1 }
 0x2e8   :  { %362 = vsyncpa [#allocation5], 1 }

// kernel: tpu_custom_call.1
= control target key start
LH: loop header
LB: loop body
LE: loop exit
PB: predicated region body
PF: predicated region fallthrough
CT: control target
= control target key end

     0   :  { %s623_s0 = inlined_call_operand.hbm [shape: bf16[8,128], index: 0, kind: input, shape index: {}]   ;;  %s624_s1 = inlined_call_operand.hbm [shape: bf16[128,128], index: 1, kind: input, shape index: {}]   ;;  %s625_s2 = inlined_call_operand.vmem [shape: f32[1,128], index: 2, kind: input, shape index: {}]   ;;  %s626_s3 = inlined_call_operand.hbm [shape: bf16[128,128], index: 3, kind: input, shape index: {}]   ;;  %s627_s4 = inlined_call_operand.vmem [shape: f32[1,128], index: 4, kind: input, shape index: {}]   ;;  %s628_s5 = inlined_call_operand.vmem [shape: f32[1,128], index: 5, kind: input, shape index: {}]   ;;  %s629_s6 = inlined_call_operand.<no memory space> [shape: f32[1,1], index: 6, kind: input, shape index: {}]   ;;  %s630_s7 = inlined_call_operand.hbm [shape: f32[1,1,8], index: 7, kind: output, shape index: {}]  }
   0x1   :  { %v12_v0 = vstv %s629_s6 }
   0x2   :  { %13 = vst [vmem:[#allocation2] sm:$0x1] %v12_v0 }
   0x3   :  { %14 = vsyncpa [#allocation4], 0 }
   0x4   :  { %15 = vsyncpa [#allocation7], 0 }
   0x5   :  { %16 = vsyncpa [#allocation5], 0  ;;  %s551_s26 = smov [#allocation6]  }
   0x6   :  { %s32_s27 = sshll.u32 %s551_s26, 4  ;;  %s33_s27 = int_to_ptr.vmem [resolvable:$true] %s32_s27 }
   0x7   :  { %s473_s28 = scalar_lea.vmem %s33_s27, 1024  ;;  %p478_p1 = scmp.lt.s32.totalorder %s33_s27, %s33_s27 }
   0x8   :  { %p474_p0 = scmp.ne.s32.totalorder %s33_s27, %s473_s28  ;;  %p479_p2 = scmp.lt.s32.totalorder %s473_s28, %s473_s28 }
   0xa   :  { %p480_p3 = por %p479_p2, %p478_p1 }
   0xc   :  { %p481_p4 = pnand %p480_p3, %p474_p0 }
   0xe   :  { %484 = shalt.err (!%p481_p4)
}
   0xf   :  { %s552_s29 = smov 64   ;;  %s553_s30 = smov 4  }
  0x10   :  { %38 = dma.hbm_to_vmem [thread:$0]  %s624_s1, 1024, %s33_s27, [#allocation7], %s552_s29, %s552_s29, %s553_s30  }
  0x11   :  { %s554_s6 = smov [#allocation3]   ;;  %s555_s11 = smov [#allocation8]  }
  0x12   :  { %s23_s10 = sshll.u32 %s554_s6, 4  ;;  %s46_s12 = sshll.u32 %s555_s11, 4  ;;  %s24_s10 = int_to_ptr.vmem [resolvable:$true] %s23_s10  ;;  %s47_s12 = int_to_ptr.vmem [resolvable:$true] %s46_s12 }
  0x13   :  { %s493_s13 = scalar_lea.vmem %s24_s10, 64  ;;  %p498_p6 = scmp.lt.s32.totalorder %s24_s10, %s24_s10 }
  0x14   :  { %p494_p5 = scmp.ne.s32.totalorder %s24_s10, %s493_s13  ;;  %p499_p7 = scmp.lt.s32.totalorder %s493_s13, %s493_s13 }
  0x16   :  { %p500_p8 = por %p499_p7, %p498_p6 }
  0x18   :  { %p501_p9 = pnand %p500_p8, %p494_p5 }
  0x1a   :  { %504 = shalt.err (!%p501_p9)
}
  0x1b   :  { %26 = dma.hbm_to_vmem [thread:$0]  %s623_s0, 64, %s24_s10, [#allocation4]  }
  0x1c   :  { %s513_s16 = scalar_lea.vmem %s47_s12, 1024  ;;  %p518_p11 = scmp.lt.s32.totalorder %s47_s12, %s47_s12 }
  0x1d   :  { %p514_p10 = scmp.ne.s32.totalorder %s47_s12, %s513_s16  ;;  %p519_p12 = scmp.lt.s32.totalorder %s513_s16, %s513_s16 }
  0x1f   :  { %p520_p13 = por %p519_p12, %p518_p11 }
  0x21   :  { %p521_p0 = pnand %p520_p13, %p514_p10 }
  0x23   :  { %524 = shalt.err (!%p521_p0)
}
  0x24   :  { %52 = dma.hbm_to_vmem [thread:$0]  %s626_s3, 1024, %s47_s12, [#allocation7], %s552_s29, %s552_s29, %s553_s30  }
  0x25   :  { %545 = dma.done.wait [#allocation4], 64  }
  0x26   :  { %546 = vsyncadd [#allocation4], 4294967232 }
  0x27   :  { %547 = dma.done.wait [#allocation7], 2048  }
  0x28   :  { %548 = vsyncadd [#allocation7], 4294965248  ;;  %v556_v1 = vmov 0.0   ;;  %vm557_vm0 = vmmov 0   ;;  %v449_v2 = vld [vmem:[#allocation6 + $0x38] sm:$0xff]   ;;  %v450_v3 = vld [vmem:[#allocation6 + $0x30] sm:$0xff]  }
  0x29   :  { %401 = vmatprep.subr.bf16.mxu0 %v556_v1  ;;  %417 = vmatprep.mubr.msk.bf16.mxu0 %vm557_vm0, %v556_v1  ;;  %v451_v4 = vld [vmem:[#allocation6 + $0x28] sm:$0xff]   ;;  %v457_v5 = vld [vmem:[#allocation8 + $0x38] sm:$0xff]   ;;  %v452_v6 = vld [vmem:[#allocation6 + $0x20] sm:$0xff]   ;;  %vm345_vm1 = vcmask 57344  }
  0x2a   :  { %421 = vmatprep.subr.bf16.mxu1 %v556_v1  ;;  %437 = vmatprep.mubr.msk.bf16.mxu1 %vm557_vm0, %v556_v1  ;;  %v458_v7 = vld [vmem:[#allocation8 + $0x30] sm:$0xff]   ;;  %v453_v8 = vld [vmem:[#allocation6 + $0x18] sm:$0xff]   ;;  %v459_v9 = vld [vmem:[#allocation8 + $0x28] sm:$0xff]  }
  0x2b   :  { %402 = vmatpush3.bf16.msra.mxu0 %v449_v2  ;;  %422 = vmatpush3.bf16.msra.mxu1 %v457_v5  ;;  %v454_v10 = vld [vmem:[#allocation6 + $0x10] sm:$0xff]   ;;  %v460_v11 = vld [vmem:[#allocation8 + $0x20] sm:$0xff]   ;;  %v455_v12 = vld [vmem:[#allocation6 + $0x8] sm:$0xff]  }
  0x2c   :  { %403 = vmatprep.subr.bf16.mxu0 %v556_v1  ;;  %423 = vmatprep.subr.bf16.mxu1 %v556_v1  ;;  %v461_v13 = vld [vmem:[#allocation8 + $0x18] sm:$0xff]   ;;  %v456_v14 = vld [vmem:[#allocation6] sm:$0xff]   ;;  %v462_v15 = vld [vmem:[#allocation8 + $0x10] sm:$0xff]  }
  0x2d   :  { %v69_v16 = vld [vmem:[#allocation3] sm:$0xf]  ;;  %v463_v17 = vld [vmem:[#allocation8 + $0x8] sm:$0xff]   ;;  %v464_v18 = vld [vmem:[#allocation8] sm:$0xff]  }
  0x2e   :  { %v363_v19 = vld [vmem:[%s625_s2] ss:$0 sm:$0xff]  ;;  %s558_s2 = smov [#allocation9]  }
  0x2f   :  { %404 = vmatpush3.bf16.msra.mxu0 %v450_v3  ;;  %424 = vmatpush3.bf16.msra.mxu1 %v458_v7  ;;  %v372_v27 = vld [vmem:[%s627_s4] ss:$0 sm:$0xff]  ;;  %s353_s22 = sshll.u32 %s558_s2, 4  ;;  %s354_s22 = int_to_ptr.vmem [resolvable:$true] %s353_s22 }
  0x30   :  { %405 = vmatprep.subr.bf16.mxu0 %v556_v1  ;;  %425 = vmatprep.subr.bf16.mxu1 %v556_v1  ;;  %v381_v31 = vld [vmem:[%s628_s5] ss:$0 sm:$0xff]  ;;  %s525_s4 = scalar_lea.vmem %s354_s22, 16  ;;  %s529_s23 = scalar_lea.vmem %s354_s22, 32 }
  0x31   :  { %v382_v36 = vld [vmem:[#allocation2] ss:$0 sm:$0xff]  ;;  %p526_p1 = scmp.ne.s32.totalorder %s354_s22, %s525_s4  ;;  %p530_p2 = scmp.lt.s32.totalorder %s354_s22, %s354_s22 }
  0x32   :  { %p531_p3 = scmp.lt.s32.totalorder %s529_s23, %s525_s4 }
  0x33   :  { %406 = vmatpush3.bf16.msra.mxu0 %v451_v4  ;;  %426 = vmatpush3.bf16.msra.mxu1 %v459_v9 }
  0x34   :  { %407 = vmatprep.subr.bf16.mxu0 %v556_v1  ;;  %427 = vmatprep.subr.bf16.mxu1 %v556_v1  ;;  %p532_p4 = por %p531_p3, %p530_p2 }
  0x36   :  { %p533_p5 = pnand %p532_p4, %p526_p1 }
  0x37   :  { %408 = vmatpush3.bf16.msra.mxu0 %v452_v6  ;;  %428 = vmatpush3.bf16.msra.mxu1 %v460_v11 }
  0x38   :  { %409 = vmatprep.subr.bf16.mxu0 %v556_v1  ;;  %429 = vmatprep.subr.bf16.mxu1 %v556_v1 }
  0x3b   :  { %410 = vmatpush3.bf16.msra.mxu0 %v453_v8  ;;  %430 = vmatpush3.bf16.msra.mxu1 %v461_v13 }
  0x3c   :  { %411 = vmatprep.subr.bf16.mxu0 %v556_v1  ;;  %431 = vmatprep.subr.bf16.mxu1 %v556_v1 }
  0x3f   :  { %412 = vmatpush3.bf16.msra.mxu0 %v454_v10  ;;  %432 = vmatpush3.bf16.msra.mxu1 %v462_v15 }
  0x40   :  { %413 = vmatprep.subr.bf16.mxu0 %v556_v1  ;;  %433 = vmatprep.subr.bf16.mxu1 %v556_v1 }
  0x43   :  { %414 = vmatpush3.bf16.msra.mxu0 %v455_v12  ;;  %434 = vmatpush3.bf16.msra.mxu1 %v463_v17 }
  0x44   :  { %415 = vmatprep.subr.bf16.mxu0 %v556_v1  ;;  %435 = vmatprep.subr.bf16.mxu1 %v556_v1 }
  0x47   :  { %416 = vmatpush3.bf16.msra.mxu0 %v456_v14  ;;  %436 = vmatpush3.bf16.msra.mxu1 %v464_v18 }
  0x4a   :  { %418 = vmatmul.mubr.bf16.vlgmr.msra.gmra.mxu0 %v69_v16 }
 0x10a   :  { %v175_v20 = vpop.f32.mrf.mxu0 }
 0x10b   :  { %v176_v21 = vadd.f32 %v363_v19, %v175_v20 }
 0x10c   :  { %v419_v22 = vpop.f32.mrf.mxu0 }
 0x10d   :  { %v181_v23 = vmax.f32 %v176_v21, 0.0 }
 0x10e   :  { %v178_v24 = vpop.f32.mrf.mxu0 }
 0x10f   :  { %v182_v25 = vpack.c.bf16 %v181_v23, %v181_v23 }
 0x110   :  { %v420_v26 = vpop.f32.mrf.mxu0 }
 0x111   :  { %438 = vmatmul.mubr.bf16.vlgmr.msra.gmra.mxu1 %v182_v25 }
 0x1d1   :  { %v288_v28 = vpop.f32.mrf.mxu1 }
 0x1d2   :  { %v289_v29 = vadd.f32 %v372_v27, %v288_v28 }
 0x1d3   :  { %v439_v30 = vpop.f32.mrf.mxu1 }
 0x1d4   :  { %v294_v32 = vmax.f32 %v289_v29, 0.0 }
 0x1d5   :  { %v291_v33 = vpop.f32.mrf.mxu1 }
 0x1d6   :  { %v303_v34 = vmul.f32 %v381_v31, %v294_v32 }
 0x1d7   :  { %v440_v35 = vpop.f32.mrf.mxu1 }
 0x1d8   :  { %304 = vadd.xlane.f32.xlu0 %v303_v34 }
 0x261   :  { %v305_v37 = vpop.xlane.xlu0 %304 }
 0x262   :  { %v312_v38 = vadd.f32 %v382_v36, %v305_v37 }
 0x264   :  { %313 = vxpose.xlu0.b32.start.end [1/1] (short) (narrow) %v312_v38, 8 }
 0x2e0   :  { %v329_v39 = vpop.trf.xlu0 }
 0x2e1   :  { %346 = vst.msk [vmem:[#allocation9] sm:$0x1] %vm345_vm1, %v329_v39 }
 0x2e2   :  { %536 = shalt.err (!%p533_p5)
}
 0x2e3   :  { %356 = dma.vmem_to_hbm [thread:$0]  %s354_s22, 16, %s630_s7, [#allocation5]  }
 0x2e4   :  { %549 = dma.done.wait [#allocation5], 16  }
 0x2e5   :  { %550 = vsyncadd [#allocation5], 4294967280 }
 0x2e6   :  { %360 = vsyncpa [#allocation4], 1 }
 0x2e7   :  { %361 = vsyncpa [#allocation7], 1 }
 0x2e8   :  { %362 = vsyncpa [#allocation5], 1 }

// kernel: tpu_custom_call.1
= control target key start
LH: loop header
LB: loop body
LE: loop exit
PB: predicated region body
PF: predicated region fallthrough
CT: control target
= control target key end

     0   :  { %s556_s0 = inlined_call_operand.hbm [shape: bf16[8,128], index: 0, kind: input, shape index: {}]   ;;  %s557_s1 = inlined_call_operand.hbm [shape: bf16[128,128], index: 1, kind: input, shape index: {}]   ;;  %s558_s2 = inlined_call_operand.vmem [shape: f32[1,128], index: 2, kind: input, shape index: {}]   ;;  %s559_s3 = inlined_call_operand.hbm [shape: bf16[128,128], index: 3, kind: input, shape index: {}]   ;;  %s560_s4 = inlined_call_operand.vmem [shape: f32[1,128], index: 4, kind: input, shape index: {}]   ;;  %s561_s5 = inlined_call_operand.vmem [shape: f32[1,128], index: 5, kind: input, shape index: {}]   ;;  %s562_s6 = inlined_call_operand.<no memory space> [shape: f32[1,1], index: 6, kind: input, shape index: {}]   ;;  %s563_s7 = inlined_call_operand.vmem [shape: f32[8,1], index: 7, kind: output, shape index: {}]  }
   0x1   :  { %v12_v0 = vstv %s562_s6 }
   0x2   :  { %13 = vst [vmem:[#allocation2] sm:$0x1] %v12_v0 }
   0x3   :  { %14 = vsyncpa [#allocation4], 0 }
   0x4   :  { %15 = vsyncpa [#allocation6], 0  ;;  %s485_s26 = smov [#allocation5]  }
   0x5   :  { %s31_s27 = sshll.u32 %s485_s26, 4  ;;  %s32_s27 = int_to_ptr.vmem [resolvable:$true] %s31_s27 }
   0x6   :  { %s429_s28 = scalar_lea.vmem %s32_s27, 1024  ;;  %p434_p1 = scmp.lt.s32.totalorder %s32_s27, %s32_s27 }
   0x7   :  { %p430_p0 = scmp.ne.s32.totalorder %s32_s27, %s429_s28  ;;  %p435_p2 = scmp.lt.s32.totalorder %s429_s28, %s429_s28 }
   0x9   :  { %p436_p3 = por %p435_p2, %p434_p1 }
   0xb   :  { %p437_p4 = pnand %p436_p3, %p430_p0 }
   0xd   :  { %440 = shalt.err (!%p437_p4)
}
   0xe   :  { %s486_s29 = smov 64   ;;  %s487_s30 = smov 4  }
   0xf   :  { %37 = dma.hbm_to_vmem [thread:$0]  %s557_s1, 1024, %s32_s27, [#allocation6], %s486_s29, %s486_s29, %s487_s30  }
  0x10   :  { %s488_s6 = smov [#allocation3]   ;;  %s489_s11 = smov [#allocation7]  }
  0x11   :  { %s22_s10 = sshll.u32 %s488_s6, 4  ;;  %s45_s12 = sshll.u32 %s489_s11, 4  ;;  %s23_s10 = int_to_ptr.vmem [resolvable:$true] %s22_s10  ;;  %s46_s12 = int_to_ptr.vmem [resolvable:$true] %s45_s12 }
  0x12   :  { %s449_s13 = scalar_lea.vmem %s23_s10, 64  ;;  %p454_p6 = scmp.lt.s32.totalorder %s23_s10, %s23_s10 }
  0x13   :  { %p450_p5 = scmp.ne.s32.totalorder %s23_s10, %s449_s13  ;;  %p455_p7 = scmp.lt.s32.totalorder %s449_s13, %s449_s13 }
  0x15   :  { %p456_p8 = por %p455_p7, %p454_p6 }
  0x17   :  { %p457_p9 = pnand %p456_p8, %p450_p5 }
  0x19   :  { %460 = shalt.err (!%p457_p9)
}
  0x1a   :  { %25 = dma.hbm_to_vmem [thread:$0]  %s556_s0, 64, %s23_s10, [#allocation4]  }
  0x1b   :  { %s469_s16 = scalar_lea.vmem %s46_s12, 1024  ;;  %p474_p11 = scmp.lt.s32.totalorder %s46_s12, %s46_s12 }
  0x1c   :  { %p470_p10 = scmp.ne.s32.totalorder %s46_s12, %s469_s16  ;;  %p475_p12 = scmp.lt.s32.totalorder %s469_s16, %s469_s16 }
  0x1e   :  { %p476_p13 = por %p475_p12, %p474_p11 }
  0x20   :  { %p477_p0 = pnand %p476_p13, %p470_p10 }
  0x22   :  { %480 = shalt.err (!%p477_p0)
}
  0x23   :  { %51 = dma.hbm_to_vmem [thread:$0]  %s559_s3, 1024, %s46_s12, [#allocation6], %s486_s29, %s486_s29, %s487_s30  }
  0x24   :  { %481 = dma.done.wait [#allocation4], 64  }
  0x25   :  { %482 = vsyncadd [#allocation4], 4294967232 }
  0x26   :  { %483 = dma.done.wait [#allocation6], 2048  }
  0x27   :  { %484 = vsyncadd [#allocation6], 4294965248  ;;  %v490_v1 = vmov 0.0   ;;  %vm491_vm0 = vmmov 0   ;;  %v405_v2 = vld [vmem:[#allocation5 + $0x38] sm:$0xff]   ;;  %v406_v3 = vld [vmem:[#allocation5 + $0x30] sm:$0xff]  }
  0x28   :  { %358 = vmatprep.subr.bf16.mxu0 %v490_v1  ;;  %374 = vmatprep.mubr.msk.bf16.mxu0 %vm491_vm0, %v490_v1  ;;  %v407_v4 = vld [vmem:[#allocation5 + $0x28] sm:$0xff]   ;;  %v413_v5 = vld [vmem:[#allocation7 + $0x38] sm:$0xff]   ;;  %v408_v6 = vld [vmem:[#allocation5 + $0x20] sm:$0xff]   ;;  %vm312_vm1 = vcmask 7168  }
  0x29   :  { %378 = vmatprep.subr.bf16.mxu1 %v490_v1  ;;  %394 = vmatprep.mubr.msk.bf16.mxu1 %vm491_vm0, %v490_v1  ;;  %v414_v7 = vld [vmem:[#allocation7 + $0x30] sm:$0xff]   ;;  %v409_v8 = vld [vmem:[#allocation5 + $0x18] sm:$0xff]   ;;  %v415_v9 = vld [vmem:[#allocation7 + $0x28] sm:$0xff]  }
  0x2a   :  { %359 = vmatpush3.bf16.msra.mxu0 %v405_v2  ;;  %379 = vmatpush3.bf16.msra.mxu1 %v413_v5  ;;  %v410_v10 = vld [vmem:[#allocation5 + $0x10] sm:$0xff]   ;;  %v416_v11 = vld [vmem:[#allocation7 + $0x20] sm:$0xff]   ;;  %v411_v12 = vld [vmem:[#allocation5 + $0x8] sm:$0xff]  }
  0x2b   :  { %360 = vmatprep.subr.bf16.mxu0 %v490_v1  ;;  %380 = vmatprep.subr.bf16.mxu1 %v490_v1  ;;  %v417_v13 = vld [vmem:[#allocation7 + $0x18] sm:$0xff]   ;;  %v412_v14 = vld [vmem:[#allocation5] sm:$0xff]   ;;  %v418_v15 = vld [vmem:[#allocation7 + $0x10] sm:$0xff]  }
  0x2c   :  { %v68_v16 = vld [vmem:[#allocation3] sm:$0xf]  ;;  %v419_v17 = vld [vmem:[#allocation7 + $0x8] sm:$0xff]   ;;  %v420_v18 = vld [vmem:[#allocation7] sm:$0xff]  }
  0x2d   :  { %v320_v19 = vld [vmem:[%s558_s2] ss:$0 sm:$0xff] }
  0x2e   :  { %361 = vmatpush3.bf16.msra.mxu0 %v406_v3  ;;  %381 = vmatpush3.bf16.msra.mxu1 %v414_v7  ;;  %v329_v27 = vld [vmem:[%s560_s4] ss:$0 sm:$0xff] }
  0x2f   :  { %362 = vmatprep.subr.bf16.mxu0 %v490_v1  ;;  %382 = vmatprep.subr.bf16.mxu1 %v490_v1  ;;  %v338_v31 = vld [vmem:[%s561_s5] ss:$0 sm:$0xff] }
  0x30   :  { %v339_v36 = vld [vmem:[#allocation2] ss:$0 sm:$0xff] }
  0x32   :  { %363 = vmatpush3.bf16.msra.mxu0 %v407_v4  ;;  %383 = vmatpush3.bf16.msra.mxu1 %v415_v9 }
  0x33   :  { %364 = vmatprep.subr.bf16.mxu0 %v490_v1  ;;  %384 = vmatprep.subr.bf16.mxu1 %v490_v1 }
  0x36   :  { %365 = vmatpush3.bf16.msra.mxu0 %v408_v6  ;;  %385 = vmatpush3.bf16.msra.mxu1 %v416_v11 }
  0x37   :  { %366 = vmatprep.subr.bf16.mxu0 %v490_v1  ;;  %386 = vmatprep.subr.bf16.mxu1 %v490_v1 }
  0x3a   :  { %367 = vmatpush3.bf16.msra.mxu0 %v409_v8  ;;  %387 = vmatpush3.bf16.msra.mxu1 %v417_v13 }
  0x3b   :  { %368 = vmatprep.subr.bf16.mxu0 %v490_v1  ;;  %388 = vmatprep.subr.bf16.mxu1 %v490_v1 }
  0x3e   :  { %369 = vmatpush3.bf16.msra.mxu0 %v410_v10  ;;  %389 = vmatpush3.bf16.msra.mxu1 %v418_v15 }
  0x3f   :  { %370 = vmatprep.subr.bf16.mxu0 %v490_v1  ;;  %390 = vmatprep.subr.bf16.mxu1 %v490_v1 }
  0x42   :  { %371 = vmatpush3.bf16.msra.mxu0 %v411_v12  ;;  %391 = vmatpush3.bf16.msra.mxu1 %v419_v17 }
  0x43   :  { %372 = vmatprep.subr.bf16.mxu0 %v490_v1  ;;  %392 = vmatprep.subr.bf16.mxu1 %v490_v1 }
  0x46   :  { %373 = vmatpush3.bf16.msra.mxu0 %v412_v14  ;;  %393 = vmatpush3.bf16.msra.mxu1 %v420_v18 }
  0x49   :  { %375 = vmatmul.mubr.bf16.vlgmr.msra.gmra.mxu0 %v68_v16 }
 0x109   :  { %v174_v20 = vpop.f32.mrf.mxu0 }
 0x10a   :  { %v175_v21 = vadd.f32 %v320_v19, %v174_v20 }
 0x10b   :  { %v376_v22 = vpop.f32.mrf.mxu0 }
 0x10c   :  { %v180_v23 = vmax.f32 %v175_v21, 0.0 }
 0x10d   :  { %v177_v24 = vpop.f32.mrf.mxu0 }
 0x10e   :  { %v181_v25 = vpack.c.bf16 %v180_v23, %v180_v23 }
 0x10f   :  { %v377_v26 = vpop.f32.mrf.mxu0 }
 0x110   :  { %395 = vmatmul.mubr.bf16.vlgmr.msra.gmra.mxu1 %v181_v25 }
 0x1d0   :  { %v287_v28 = vpop.f32.mrf.mxu1 }
 0x1d1   :  { %v288_v29 = vadd.f32 %v329_v27, %v287_v28 }
 0x1d2   :  { %v396_v30 = vpop.f32.mrf.mxu1 }
 0x1d3   :  { %v293_v32 = vmax.f32 %v288_v29, 0.0 }
 0x1d4   :  { %v290_v33 = vpop.f32.mrf.mxu1 }
 0x1d5   :  { %v302_v34 = vmul.f32 %v338_v31, %v293_v32 }
 0x1d6   :  { %v397_v35 = vpop.f32.mrf.mxu1 }
 0x1d7   :  { %303 = vadd.xlane.f32.xlu0 %v302_v34 }
 0x260   :  { %v304_v37 = vpop.xlane.xlu0 %303 }
 0x261   :  { %v311_v38 = vadd.f32 %v339_v36, %v304_v37 }
 0x263   :  { %313 = vst.msk [vmem:[%s563_s7] sm:$0xff] %vm312_vm1, %v311_v38 }
 0x264   :  { %318 = vsyncpa [#allocation4], 1 }
 0x265   :  { %319 = vsyncpa [#allocation6], 1 }

</bundles_post_ra>
